<compile_context>
chip_gen: v6e
topology: v6e:2x2x1
jax: 0.10.0
libtpu: 0.0.40
codegen_flags: <defaults>
</compile_context>

<pallas_src>
import jax
import jax.numpy as jnp
from jax.experimental import pallas as pl
from jax.experimental.pallas import tpu as pltpu


def _binary_pred_kernel(x_ref, w_ref, b_ref, o_ref):
    # x_ref: [tm, H]  token block (VMEM, streamed, auto double-buffered)
    # w_ref: [1, H]   out_proj weight, PyTorch layout (VMEM, resident)
    # b_ref: [1]      out_proj bias (SMEM scalar, f32)
    # o_ref: [tm, 1]  f32 logits for this token block
    prod = x_ref[...] * w_ref[...]            # VPU: broadcast [1,H] over rows
    y = jnp.sum(prod, axis=-1, keepdims=True, dtype=jnp.float32)  # XLU reduce, f32 acc
    o_ref[...] = y + b_ref[0]


def _physical_vmem_bytes():
    """Physical VMEM per TensorCore; conservative (v7x) fallback."""
    try:
        info = pltpu.get_tpu_info()
        return int(getattr(info, "vmem_capacity_bytes", 64 * 1024 * 1024))
    except Exception:
        return 64 * 1024 * 1024


def _pick_tile(M, H, itemsize, vmem_cap):
    """Largest token tile whose double-buffered x stream fits ~half of VMEM,
    capped so the grid keeps >= 8 steps when there are enough tokens."""
    budget = vmem_cap // 2                        # for the 2x-buffered x stream
    tm = budget // (2 * H * itemsize)
    tm = min(tm, 2048)
    if M >= 8 * 64:                               # enough tokens: keep >= 8 grid steps
        tm = min(tm, M // 8)                      # so both v7x TCs get work
    if tm >= M:
        return M                                  # single full-extent block
    return max(8, (tm // 8) * 8)                  # (8,128) sublane rule


def cocolm_binary_predictions(hidden_states, out_proj_w, out_proj_b):
    """hidden_states: [..., H]; out_proj_w: [1, H] (PyTorch layout); out_proj_b: [1].

    Returns f32 logits of shape hidden_states.shape[:-1]."""
    *lead, H = hidden_states.shape
    M = 1
    for d in lead:
        M *= d

    x = hidden_states.reshape(M, H)                  # contiguous reshape, no copy
    w = out_proj_w.reshape(1, H)                     # native layout, no transpose
    b = out_proj_b.reshape(1).astype(jnp.float32)    # SMEM scalar

    itemsize = jnp.dtype(hidden_states.dtype).itemsize
    vmem_cap = _physical_vmem_bytes()
    tm = _pick_tile(M, H, itemsize, vmem_cap)
    grid = (pl.cdiv(M, tm),)

    # VMEM actually needed: double-buffered x tile + double-buffered out tile
    # + resident weight + slack; always stays well under physical capacity.
    needed = 2 * tm * H * itemsize + 2 * tm * 4 + 2 * H * itemsize + (1 << 20)
    vmem_limit = int(min(int(0.9 * vmem_cap), max(32 * 1024 * 1024, needed)))

    cost = pl.CostEstimate(
        flops=2 * M * H,
        transcendentals=0,
        bytes_accessed=M * H * itemsize + H * itemsize + M * 4 + 4,
    )

    out = pl.pallas_call(
        _binary_pred_kernel,
        out_shape=jax.ShapeDtypeStruct((M, 1), jnp.float32),
        grid=grid,
        in_specs=[
            pl.BlockSpec((tm, H), lambda i: (i, 0)),            # stream token tiles
            pl.BlockSpec((1, H), lambda i: (0, 0)),             # weight stays resident
            pl.BlockSpec(memory_space=pltpu.MemorySpace.SMEM),  # scalar bias
        ],
        out_specs=pl.BlockSpec((tm, 1), lambda i: (i, 0)),      # f32 logits column
        compiler_params=pltpu.CompilerParams(
            dimension_semantics=("parallel",),                  # split across TCs (v7x)
            vmem_limit_bytes=vmem_limit,
        ),
        cost_estimate=cost,
    )(x, w, b)

    return out.reshape(tuple(lead))


def _reference(hidden_states, out_proj_w, out_proj_b):
    x = hidden_states.astype(jnp.float32)
    w = out_proj_w.astype(jnp.float32)
    b = out_proj_b.astype(jnp.float32)
    return (jnp.einsum("bsh,oh->bso", x, w) + b)[..., 0]


if __name__ == "__main__":
    B, S, H = 2, 8, 32

    key = jax.random.PRNGKey(0)
    k_h, k_w, k_b = jax.random.split(key, 3)

    hidden_states = jax.random.normal(k_h, (B, S, H), dtype=jnp.float32)
    # Deterministic synthetic parameters in PyTorch Linear(H, 1) layout.
    out_proj_w = jax.random.normal(k_w, (1, H), dtype=jnp.float32) * 0.02   # [out=1, in=H]
    out_proj_b = jax.random.normal(k_b, (1,), dtype=jnp.float32) * 0.02

    logits = cocolm_binary_predictions(hidden_states, out_proj_w, out_proj_b)
    logits = jax.block_until_ready(logits)

    ref = _reference(hidden_states, out_proj_w, out_proj_b)
    assert logits.shape == (B, S), f"bad shape {logits.shape}"
    assert logits.dtype == jnp.float32, f"bad dtype {logits.dtype}"
    assert jnp.allclose(logits, ref, atol=1e-5, rtol=1e-5), "mismatch vs reference"

    print("KERNEL_OK")
</pallas_src>

<mosaic_0001>
module attributes {stable_mosaic.version = 11 : i64} {
  func.func @_binary_pred_kernel(%arg0: i32, %arg1: memref<16x32xf32, #tpu.memory_space<vmem>>, %arg2: memref<1x32xf32, #tpu.memory_space<vmem>>, %arg3: memref<1xf32, #tpu.memory_space<smem>>, %arg4: memref<16x1xf32, #tpu.memory_space<vmem>>) attributes {dimension_semantics = [#tpu.dimension_semantics<parallel>], iteration_bounds = array<i64: 1>, scalar_prefetch = 0 : i64, scratch_operands = 0 : i64, tpu.core_type = #tpu.core_type<tc>, window_params = [{transform_indices = @transform_0, window_bounds = array<i64: 16, 32>}, {pipeline_mode = #tpu.pipeline_mode<synchronous>, transform_indices = @transform_1, window_bounds = array<i64: 1, 32>}, {transform_indices = @transform_2, window_bounds = array<i64: 1>}, {transform_indices = @transform_3, window_bounds = array<i64: 16, 1>}]} {
    %c0 = arith.constant 0 : index
    %c0_0 = arith.constant 0 : index
    %0 = vector.load %arg1[%c0, %c0_0] : memref<16x32xf32, #tpu.memory_space<vmem>>, vector<16x32xf32>
    %c0_1 = arith.constant 0 : index
    %c0_2 = arith.constant 0 : index
    %1 = vector.load %arg2[%c0_1, %c0_2] : memref<1x32xf32, #tpu.memory_space<vmem>>, vector<1x32xf32>
    %2 = vector.broadcast %1 : vector<1x32xf32> to vector<16x32xf32>
    %3 = arith.mulf %0, %2 : vector<16x32xf32>
    %cst = arith.constant dense<0.000000e+00> : vector<16xf32>
    %4 = vector.multi_reduction <add>, %3, %cst [1] : vector<16x32xf32> to vector<16xf32>
    %5 = vector.shape_cast %4 : vector<16xf32> to vector<16x1xf32>
    %c0_3 = arith.constant 0 : index
    %6 = memref.load %arg3[%c0_3] : memref<1xf32, #tpu.memory_space<smem>>
    %7 = vector.broadcast %6 : f32 to vector<16x1xf32>
    %8 = arith.addf %5, %7 : vector<16x1xf32>
    %c0_4 = arith.constant 0 : index
    %c0_5 = arith.constant 0 : index
    %9 = vector.load %arg4[%c0_4, %c0_5] : memref<16x1xf32, #tpu.memory_space<vmem>>, vector<16x1xf32>
    tpu.vector_store %arg4[%c0_4, %c0_5], %8 {strides = array<i32>} : memref<16x1xf32, #tpu.memory_space<vmem>>, vector<16x1xf32>,
    return
  }
  func.func @transform_0(%arg0: i32) -> (i32, i32) {
    %c0_i32 = arith.constant 0 : i32
    %c0_i32_0 = arith.constant 0 : i32
    return %arg0, %c0_i32 : i32, i32
  }
  func.func @transform_1(%arg0: i32) -> (i32, i32) {
    %c0_i32 = arith.constant 0 : i32
    %c0_i32_0 = arith.constant 0 : i32
    %c0_i32_1 = arith.constant 0 : i32
    return %c0_i32, %c0_i32_0 : i32, i32
  }
  func.func @transform_2(%arg0: i32) -> i32 {
    %c0_i32 = arith.constant 0 : i32
    %c0_i32_0 = arith.constant 0 : i32
    return %c0_i32 : i32
  }
  func.func @transform_3(%arg0: i32) -> (i32, i32) {
    %c0_i32 = arith.constant 0 : i32
    %c0_i32_0 = arith.constant 0 : i32
    return %arg0, %c0_i32 : i32, i32
  }
}

</mosaic_0001>

<bundles_post_ra>
// kernel: tpu_custom_call.1
= control target key start
LH: loop header
LB: loop body
LE: loop exit
PB: predicated region body
PF: predicated region fallthrough
CT: control target
= control target key end

     0   :  { %9 = vsyncpa [#allocation4], 0  ;;  %s85_s12 = smov [#allocation3]   ;;  %s123_s0 = inlined_call_operand.hbm [shape: f32[16,32], index: 0, kind: input, shape index: {}]   ;;  %s124_s1 = inlined_call_operand.vmem [shape: f32[1,32], index: 1, kind: input, shape index: {}]   ;;  %s125_s2 = inlined_call_operand.<no memory space> [shape: f32[1], index: 2, kind: input, shape index: {}]   ;;  %s126_s3 = inlined_call_operand.vmem [shape: f32[16,1], index: 3, kind: output, shape index: {}]  }
   0x1   :  { %s15_s13 = sshll.u32 %s85_s12, 4  ;;  %s16_s13 = int_to_ptr.vmem [resolvable:$true] %s15_s13 }
   0x2   :  { %s71_s14 = scalar_lea.vmem %s16_s13, 256  ;;  %p76_p1 = scmp.lt.s32.totalorder %s16_s13, %s16_s13 }
   0x3   :  { %p72_p0 = scmp.ne.s32.totalorder %s16_s13, %s71_s14  ;;  %p77_p2 = scmp.lt.s32.totalorder %s71_s14, %s71_s14 }
   0x5   :  { %p78_p3 = por %p77_p2, %p76_p1 }
   0x7   :  { %p79_p4 = pnand %p78_p3, %p72_p0 }
   0x9   :  { %82 = shalt.err (!%p79_p4)
}
   0xa   :  { %s86_s15 = smov 128   ;;  %s87_s16 = smov 8  }
   0xb   :  { %21 = dma.hbm_to_vmem [thread:$0]  %s123_s0, 256, %s16_s13, [#allocation4], %s86_s15, %s86_s15, %s87_s16  }
   0xc   :  { %83 = dma.done.wait [#allocation4], 256  }
   0xd   :  { %84 = vsyncadd [#allocation4], 4294967040  ;;  %v29_v0 = vld [vmem:[#allocation3] sm:$0xff]  ;;  %vm40_vm0 = vcmask 261120   ;;  %v30_v2 = vld [vmem:[#allocation3 + $0x8] sm:$0xff]  ;;  %v48_v7 = vstv %s125_s2  ;;  %vm51_vm1 = vcmask 7168  }
   0xe   :  { %v59_v1 = vld [vmem:[%s124_s1] ss:$0 sm:$0xff] }
   0xf   :  { %v38_v3 = vmul.f32 %v59_v1, %v29_v0  ;;  %v39_v4 = vmul.f32 %v59_v1, %v30_v2 }
  0x11   :  { %v41_v5 = vsel %vm40_vm0, %v38_v3, 0.0  ;;  %v44_v6 = vsel %vm40_vm0, %v39_v4, 0.0 }
  0x12   :  { %42 = vadd.xlane.f32.xlu0 %v41_v5 }
  0x16   :  { %45 = vadd.xlane.f32.xlu0 %v44_v6 }
  0x9b   :  { %v43_v8 = vpop.xlane.xlu0 %42 }
  0x9c   :  { %v49_v9 = vadd.f32 %v48_v7, %v43_v8 }
  0x9e   :  { %52 = vst.msk [vmem:[%s126_s3] sm:$0xff] %vm51_vm1, %v49_v9 }
  0x9f   :  { %v46_v10 = vpop.xlane.xlu0 %45 }
  0xa0   :  { %v50_v11 = vadd.f32 %v48_v7, %v46_v10 }
  0xa2   :  { %53 = vst.msk [vmem:[%s126_s3 + $0x8] sm:$0xff] %vm51_vm1, %v50_v11 }
  0xa3   :  { %58 = vsyncpa [#allocation4], 1 }

</bundles_post_ra>
